<compile_context>
chip_gen: v7x
topology: tpu7x:2x2x1
jax: 0.10.0
libtpu: 0.0.40
codegen_flags: <defaults>
</compile_context>

<pallas_src>
import math

import jax
import jax.numpy as jnp
from jax.experimental import pallas as pl
from jax.experimental.pallas import tpu as pltpu

P_DROP = 0.1  # nn.Dropout(p=0.1); module is in training mode by default


def make_pe(max_len, d_model):
    """Exact reproduction of the module's __init__ buffer, shape (max_len, d_model)."""
    position = jnp.arange(max_len, dtype=jnp.float32)[:, None]            # (max_len, 1)
    div_term = jnp.exp(
        jnp.arange(0, d_model, 2, dtype=jnp.float32) * (-math.log(10000.0) / d_model)
    )                                                                      # (d_model//2,)
    ang = position * div_term                                              # (max_len, d//2)
    pe = jnp.zeros((max_len, d_model), dtype=jnp.float32)
    pe = pe.at[:, 0::2].set(jnp.sin(ang))
    pe = pe.at[:, 1::2].set(jnp.cos(ang))
    return pe


def make_dropout_mask(key, shape, p_drop, dtype):
    """Inverted-dropout mask: keep with prob (1-p), survivors pre-scaled by 1/(1-p)."""
    keep = jax.random.bernoulli(key, 1.0 - p_drop, shape)
    return keep.astype(dtype) * (1.0 / (1.0 - p_drop))


def _add_pe_dropout_kernel(x_ref, pe_ref, mask_ref, o_ref):
    # x_ref, mask_ref, o_ref: (TS, B, D) VMEM; pe_ref: (TS, 1, D) VMEM.
    # pe broadcasts over the batch (sublane) axis inside the kernel; the mask is
    # already scaled by 1/(1-p), so dropout is a single fused multiply.
    o_ref[...] = (x_ref[...] + pe_ref[...]) * mask_ref[...]


def positional_encoding_forward(x, pe_full, dropout_key, *, p_drop=P_DROP, block_s=None):
    """x: (S, B, D); pe_full: (max_len, D); returns (S, B, D) = dropout(x + pe[:S])."""
    S, B, D = x.shape
    pe = pe_full[:S][:, None, :]                      # pe.unsqueeze(0).transpose(0,1)[:S]
    mask = make_dropout_mask(dropout_key, (S, B, D), p_drop, x.dtype)

    if block_s is None:
        # ~2 MiB of x per tile -> x + mask + out tiles (double-buffered) stay well
        # under the default scoped-VMEM limits (16 MiB v5e, 32 MiB v6e/v7x).
        bytes_per_row = B * D * x.dtype.itemsize
        block_s = max(1, (2 * 1024 * 1024) // max(1, bytes_per_row))
    block_s = int(min(block_s, S))
    grid = (pl.cdiv(S, block_s),)

    flops = 2 * S * B * D                                       # one add + one mul / elem
    bytes_accessed = x.dtype.itemsize * (3 * S * B * D + S * D)  # x + mask + out + pe

    return pl.pallas_call(
        _add_pe_dropout_kernel,
        out_shape=jax.ShapeDtypeStruct((S, B, D), x.dtype),
        grid=grid,
        in_specs=[
            pl.BlockSpec((block_s, B, D), lambda i: (i, 0, 0)),   # x tile
            pl.BlockSpec((block_s, 1, D), lambda i: (i, 0, 0)),   # pe tile (bcast over B)
            pl.BlockSpec((block_s, B, D), lambda i: (i, 0, 0)),   # dropout mask tile
        ],
        out_specs=pl.BlockSpec((block_s, B, D), lambda i: (i, 0, 0)),
        compiler_params=pltpu.CompilerParams(
            dimension_semantics=("parallel",),   # independent tiles -> both v7x TCs
        ),
        cost_estimate=pl.CostEstimate(
            flops=flops, transcendentals=0, bytes_accessed=bytes_accessed
        ),
    )(x, pe, mask)


def positional_encoding_reference(x, pe_full, dropout_key, *, p_drop=P_DROP):
    """Pure-JAX reference with the identical dropout mask (same key/helper)."""
    S, B, D = x.shape
    pe = pe_full[:S][:, None, :]
    mask = make_dropout_mask(dropout_key, (S, B, D), p_drop, x.dtype)
    return (x + pe) * mask


if __name__ == "__main__":
    # Small shapes consistent with the module's forward: (seq, batch, d_model)
    S, B, D = 8, 2, 32
    MAX_LEN = 64  # module default is 5000; 64 is plenty for S=8 and keeps it small

    root = jax.random.PRNGKey(0)
    kx, kdrop = jax.random.split(root)
    x = jax.random.normal(kx, (S, B, D), dtype=jnp.float32)
    pe_full = make_pe(MAX_LEN, D)

    # block_s=4 -> grid=(2,) so the tiled/pipelined path is exercised even at demo size.
    out = positional_encoding_forward(x, pe_full, kdrop, block_s=4)
    jax.block_until_ready(out)

    ref = positional_encoding_reference(x, pe_full, kdrop)
    assert out.shape == (S, B, D) and out.dtype == jnp.float32
    assert jnp.allclose(out, ref, atol=1e-6, rtol=1e-6)
    print("KERNEL_OK")
</pallas_src>

<mosaic_0001>
module attributes {stable_mosaic.version = 11 : i64} {
  func.func @_add_pe_dropout_kernel(%arg0: i32, %arg1: memref<4x2x32xf32, #tpu.memory_space<vmem>>, %arg2: memref<4x1x32xf32, #tpu.memory_space<vmem>>, %arg3: memref<4x2x32xf32, #tpu.memory_space<vmem>>, %arg4: memref<4x2x32xf32, #tpu.memory_space<vmem>>) attributes {dimension_semantics = [#tpu.dimension_semantics<parallel>], iteration_bounds = array<i64: 2>, scalar_prefetch = 0 : i64, scratch_operands = 0 : i64, tpu.core_type = #tpu.core_type<tc>, window_params = [{transform_indices = @transform_0, window_bounds = array<i64: 4, 2, 32>}, {transform_indices = @transform_1, window_bounds = array<i64: 4, 1, 32>}, {transform_indices = @transform_2, window_bounds = array<i64: 4, 2, 32>}, {transform_indices = @transform_3, window_bounds = array<i64: 4, 2, 32>}]} {
    %c0 = arith.constant 0 : index
    %c0_0 = arith.constant 0 : index
    %c0_1 = arith.constant 0 : index
    %0 = vector.load %arg1[%c0, %c0_0, %c0_1] : memref<4x2x32xf32, #tpu.memory_space<vmem>>, vector<4x2x32xf32>
    %c0_2 = arith.constant 0 : index
    %c0_3 = arith.constant 0 : index
    %c0_4 = arith.constant 0 : index
    %1 = vector.load %arg2[%c0_2, %c0_3, %c0_4] : memref<4x1x32xf32, #tpu.memory_space<vmem>>, vector<4x1x32xf32>
    %2 = vector.broadcast %1 : vector<4x1x32xf32> to vector<4x2x32xf32>
    %3 = arith.addf %0, %2 : vector<4x2x32xf32>
    %c0_5 = arith.constant 0 : index
    %c0_6 = arith.constant 0 : index
    %c0_7 = arith.constant 0 : index
    %4 = vector.load %arg3[%c0_5, %c0_6, %c0_7] : memref<4x2x32xf32, #tpu.memory_space<vmem>>, vector<4x2x32xf32>
    %5 = arith.mulf %3, %4 : vector<4x2x32xf32>
    %c0_8 = arith.constant 0 : index
    %c0_9 = arith.constant 0 : index
    %c0_10 = arith.constant 0 : index
    %6 = vector.load %arg4[%c0_8, %c0_9, %c0_10] : memref<4x2x32xf32, #tpu.memory_space<vmem>>, vector<4x2x32xf32>
    tpu.vector_store %arg4[%c0_8, %c0_9, %c0_10], %5 {strides = array<i32>} : memref<4x2x32xf32, #tpu.memory_space<vmem>>, vector<4x2x32xf32>,
    return
  }
  func.func @transform_0(%arg0: i32) -> (i32, i32, i32) {
    %c0_i32 = arith.constant 0 : i32
    %c0_i32_0 = arith.constant 0 : i32
    %c0_i32_1 = arith.constant 0 : i32
    return %arg0, %c0_i32, %c0_i32_0 : i32, i32, i32
  }
  func.func @transform_1(%arg0: i32) -> (i32, i32, i32) {
    %c0_i32 = arith.constant 0 : i32
    %c0_i32_0 = arith.constant 0 : i32
    %c0_i32_1 = arith.constant 0 : i32
    return %arg0, %c0_i32, %c0_i32_0 : i32, i32, i32
  }
  func.func @transform_2(%arg0: i32) -> (i32, i32, i32) {
    %c0_i32 = arith.constant 0 : i32
    %c0_i32_0 = arith.constant 0 : i32
    %c0_i32_1 = arith.constant 0 : i32
    return %arg0, %c0_i32, %c0_i32_0 : i32, i32, i32
  }
  func.func @transform_3(%arg0: i32) -> (i32, i32, i32) {
    %c0_i32 = arith.constant 0 : i32
    %c0_i32_0 = arith.constant 0 : i32
    %c0_i32_1 = arith.constant 0 : i32
    return %arg0, %c0_i32, %c0_i32_0 : i32, i32, i32
  }
}

</mosaic_0001>

<bundles_post_ra>
// kernel: tpu_custom_call.1
= control target key start
LH: loop header
LB: loop body
LE: loop exit
PB: predicated region body
PF: predicated region fallthrough
CT: control target
= control target key end

     0   :  { %s989_s0 = inlined_call_operand.hbm [shape: f32[8,2,32], index: 0, kind: input, shape index: {}]   ;;  %s990_s1 = inlined_call_operand.hbm [shape: f32[8,1,32], index: 1, kind: input, shape index: {}]   ;;  %s991_s2 = inlined_call_operand.hbm [shape: f32[8,2,32], index: 2, kind: input, shape index: {}]   ;;  %s992_s3 = inlined_call_operand.hbm [shape: f32[8,2,32], index: 3, kind: output, shape index: {}]  }
   0x1   :  { %995 = sst [smem:[#allocation12_spill]] %s989_s0 }
   0x2   :  { %8 = vsyncpa [#allocation3], 0 }
   0x3   :  { %10 = vsyncpa [#allocation3 + $0x1], 0 }
   0x4   :  { %11 = vsyncpa [#allocation6], 0 }
   0x5   :  { %13 = vsyncpa [#allocation6 + $0x1], 0 }
   0x6   :  { %14 = vsyncpa [#allocation4], 0 }
   0x7   :  { %16 = vsyncpa [#allocation4 + $0x1], 0  ;;  %s733_s12 = smov 0   ;;  %s735_s13 = smov 0  }
   0x8   :  { %s737_s14 = smov 0   ;;  %s739_s15 = smov 0  }
   0x9 LB: > { %s754_s16 = sadd.s32 4294967295, %s701_s15   ;;  %s449_s17 = sadd.s32 4294967294, %s701_s15   ;;  %s701_s15 = sphi %s739_s15, %s1012_s15   ;;  %s697_s14 = sphi %s737_s14, %s1011_s14   ;;  %s693_s13 = sphi %s735_s13, %s1010_s13   ;;  %s689_s12 = sphi %s733_s12, %s1009_s12  }
   0xa   : > { %s758_s18 = sadd.s32 1, %s701_s15   ;;  %s29_s19 = sadd.s32 1, %s697_s14 }
   0xb   : > { %s26_s20 = ssub.s32 %s701_s15, %s758_s18  ;;  %p36_p0 = scmp.ne.s32.totalorder %s697_s14, %s693_s13 }
   0xc   : > { %p27_p1 = scmp.eq.s32.totalorder %s26_s20, 0  ;;  %p37_p2 = scmp.eq.s32.totalorder %s701_s15, 0 }
   0xd   : > { %p42_p3 = scmp.ne.s32.totalorder %s693_s13, %s689_s12  ;;  %p43_p4 = scmp.eq.s32.totalorder %s754_s16, 0 }
   0xe   : > { %s770_s21 = scalar_select %p27_p1, %s697_s14, %s29_s19  }
   0xf   : > { %p38_p5 = por %p37_p2, %p36_p0  ;;  %p772_p6 = por %p43_p4, %p42_p3 }
  0x10   : > { %p118_p7 = scmp.eq.s32.totalorder %s754_s16, 1  ;;  %p124_p8 = scmp.eq.s32.totalorder %s449_s17, 1 }
  0x11   : > { %s996_s22 = scalar_select %p772_p6, 1, 0 }
  0x12   : > { %p501_p10 = scmp.lt.s32.totalorder %s701_s15, 2  ;;  %p779_p11 = por %p118_p7, %p36_p0 }
  0x13   : > { %p783_p12 = por %p124_p8, %p42_p3  ;;  %s788_s25 = sand.u32 1, %s697_s14  }
  0x14   : > { %s997_s23 = scalar_select %p779_p11, 1, 0 }
  0x15   : > { %s998_s24 = scalar_select %p783_p12, 1, 0 }
  0x16   : > { %p790_p13 = pnand %p501_p10, %p38_p5  ;;  %s165_s27 = sand.u32 1, %s701_s15  }
  0x17   : > { %s455_s28 = sshll.u32 %s788_s25, 2  ;;  %s476_s29 = sshll.u32 %s701_s15, 6 }
  0x18   : > { %s800_s5 = scalar_lea.hbm %s990_s1, %s476_s29  ;;  %s169_s6 = scalar_lea.vmem [#allocation5], %s455_s28 }
  0x19   : > { %s176_s7 = sshll.u32 %s169_s6, 4  ;;  %s805_s8 = scalar_lea.sflag [#allocation6], %s165_s27  ;;  %s802_s7 = int_to_ptr.vmem [resolvable:$true] %s176_s7 }
  0x1a   : > { %s541_s9 = scalar_lea.hbm %s800_s5, 64  ;;  %p811_p2 = pneg %p790_p13 }
  0x1b   : > { %p542_p1 = scmp.ne.s32.totalorder %s800_s5, %s541_s9  ;;  %s546_s19 = scalar_lea.hbm %s990_s1, 128 }
  0x1c   : > { %p547_p5 = scmp.lt.u32.totalorder %s800_s5, %s990_s1  ;;  %p548_p7 = scmp.lt.u32.totalorder %s546_s19, %s541_s9 }
  0x1d   : > { %p544_p3 = pnand %p811_p2, %p542_p1  ;;  %p550_p10 = scmp.lt.u32.totalorder %s541_s9, %s800_s5 }
  0x1e   : > { %p549_p8 = por %p548_p7, %p547_p5 }
  0x1f   : > { %p545_p4 = pneg %p544_p3 }
  0x20   : > { %p551_p9 = por %p550_p10, %p549_p8 }
  0x22   : > { %p552_p0 = pnand %p551_p9, %p545_p4 }
  0x24   : > { %555 = shalt.err (!%p552_p0)
}
  0x25   : > { %s556_s27 = scalar_lea.vmem %s802_s7, 64  ;;  %s703_s29 = smov [#allocation5]  }
  0x26   : > { %p557_p1 = scmp.ne.s32.totalorder %s802_s7, %s556_s27  ;;  %s561_s30 = sshll.u32 %s703_s29, 4  ;;  %s562_s30 = int_to_ptr.vmem [resolvable:$false] %s561_s30 }
  0x27   : > { %s563_s4 = scalar_lea.vmem %s562_s30, 128  ;;  %p564_p11 = scmp.lt.s32.totalorder %s802_s7, %s562_s30 }
  0x28   : > { %p559_p3 = pnand %p557_p1, %p811_p2  ;;  %p565_p6 = scmp.lt.s32.totalorder %s563_s4, %s556_s27 }
  0x2a   : > { %p560_p12 = pneg %p559_p3  ;;  %p566_p5 = por %p565_p6, %p564_p11 }
  0x2c   : > { %p567_p7 = pnand %p566_p5, %p560_p12 }
  0x2e   : > { %570 = shalt.err (!%p567_p7)
}
  0x2f   : > { %s704_s6 = smov 16   ;;  %s705_s9 = smov 1  }
  0x30   : > { %493 = dma.hbm_to_vmem [thread:$0]  (!%p790_p13), %s800_s5, 64, %s802_s7, %s805_s8, %s704_s6, %s704_s6, %s705_s9  }
  0x31   : > { %p205_p9 = scmp.lt.s32.totalorder %s701_s15, 3  ;;  %s452_s11 = sshll.u32 %s788_s25, 3 }
  0x32   : > { %s475_s17 = sshll.u32 %s701_s15, 7  ;;  %p1001_p6 = scmp.ge.s32.totalorder %s701_s15, 1 }
  0x33   : > { %s1003_s0 = sld [smem:[#allocation12_spill]]  ;;  %s148_s5 = scalar_lea.vmem [#allocation2], %s452_s11 }
  0x34   : > { %p840_p11 = pnand %p1001_p6, %p205_p9  ;;  %s155_s7 = sshll.u32 %s148_s5, 4  ;;  %s853_s7 = int_to_ptr.vmem [resolvable:$true] %s155_s7 }
  0x35   : > { %s145_s29 = scalar_lea.sflag [#allocation3], %s788_s25 }
  0x36   : > { %s1002_s19 = scalar_select %p840_p11, 1, 0 }
  0x39   : > { %s849_s27 = scalar_lea.hbm %s1003_s0, %s475_s17  ;;  %s576_s9 = scalar_lea.hbm %s1003_s0, 256 }
  0x3a   : > { %s571_s30 = scalar_lea.hbm %s849_s27, 128  ;;  %p577_p8 = scmp.lt.u32.totalorder %s849_s27, %s1003_s0 }
  0x3b   : > { %p572_p12 = scmp.ne.s32.totalorder %s849_s27, %s571_s30  ;;  %p578_p10 = scmp.lt.u32.totalorder %s576_s9, %s571_s30 }
  0x3c   : > { %p580_p3 = scmp.lt.u32.totalorder %s571_s30, %s849_s27 }
  0x3d   : > { %p574_p0 = pnand %p572_p12, %p811_p2  ;;  %p579_p1 = por %p578_p10, %p577_p8 }
  0x3f   : > { %p575_p4 = pneg %p574_p0  ;;  %p581_p5 = por %p580_p3, %p579_p1 }
  0x41   : > { %p582_p7 = pnand %p581_p5, %p575_p4 }
  0x43   : > { %585 = shalt.err (!%p582_p7)
}
  0x44   : > { %s586_s5 = scalar_lea.vmem %s853_s7, 128  ;;  %s706_s4 = smov [#allocation2]  }
  0x45   : > { %p587_p9 = scmp.ne.s32.totalorder %s853_s7, %s586_s5  ;;  %s591_s6 = sshll.u32 %s706_s4, 4  ;;  %s592_s6 = int_to_ptr.vmem [resolvable:$false] %s591_s6 }
  0x46   : > { %s593_s20 = scalar_lea.vmem %s592_s6, 256  ;;  %p594_p0 = scmp.lt.s32.totalorder %s853_s7, %s592_s6 }
  0x47   : > { %p589_p6 = pnand %p587_p9, %p811_p2  ;;  %p595_p11 = scmp.lt.s32.totalorder %s593_s20, %s586_s5 }
  0x49   : > { %p590_p12 = pneg %p589_p6  ;;  %p596_p8 = por %p595_p11, %p594_p0 }
  0x4b   : > { %p597_p10 = pnand %p596_p8, %p590_p12 }
  0x4d   : > { %600 = shalt.err (!%p597_p10)
}
  0x4e   : > { %s707_s30 = smov 32   ;;  %s708_s9 = smov 2  }
  0x4f   : > { %490 = dma.hbm_to_vmem [thread:$0]  (!%p790_p13), %s849_s27, 128, %s853_s7, %s145_s29, %s707_s30, %s707_s30, %s708_s9  }
  0x50   : > { %s887_s4 = scalar_lea.hbm %s991_s2, %s475_s17  ;;  %s190_s6 = scalar_lea.vmem [#allocation7], %s452_s11 }
  0x51   : > { %s197_s20 = sshll.u32 %s190_s6, 4  ;;  %s601_s0 = scalar_lea.hbm %s887_s4, 128  ;;  %s891_s20 = int_to_ptr.vmem [resolvable:$true] %s197_s20 }
  0x52   : > { %p602_p11 = scmp.ne.s32.totalorder %s887_s4, %s601_s0  ;;  %s606_s29 = scalar_lea.hbm %s991_s2, 256 }
  0x53   : > { %p607_p3 = scmp.lt.u32.totalorder %s887_s4, %s991_s2  ;;  %p608_p5 = scmp.lt.u32.totalorder %s606_s29, %s601_s0 }
  0x54   : > { %p604_p4 = pnand %p602_p11, %p811_p2  ;;  %p610_p9 = scmp.lt.u32.totalorder %s601_s0, %s887_s4 }
  0x55   : > { %p609_p7 = por %p608_p5, %p607_p3 }
  0x56   : > { %p605_p1 = pneg %p604_p4 }
  0x57   : > { %p611_p6 = por %p610_p9, %p609_p7 }
  0x59   : > { %p612_p12 = pnand %p611_p6, %p605_p1 }
  0x5b   : > { %615 = shalt.err (!%p612_p12)
}
  0x5c   : > { %s616_s25 = scalar_lea.vmem %s891_s20, 128  ;;  %s709_s11 = smov [#allocation7]  }
  0x5d   : > { %p617_p0 = scmp.ne.s32.totalorder %s891_s20, %s616_s25  ;;  %s621_s5 = sshll.u32 %s709_s11, 4  ;;  %s622_s5 = int_to_ptr.vmem [resolvable:$false] %s621_s5 }
  0x5e   : > { %s623_s6 = scalar_lea.vmem %s622_s5, 256  ;;  %p624_p11 = scmp.lt.s32.totalorder %s891_s20, %s622_s5 }
  0x5f   : > { %p619_p8 = pnand %p617_p0, %p811_p2  ;;  %p625_p4 = scmp.lt.s32.totalorder %s623_s6, %s616_s25 }
  0x61   : > { %p620_p10 = pneg %p619_p8  ;;  %p626_p3 = por %p625_p4, %p624_p11 }
  0x63   : > { %p627_p5 = pnand %p626_p3, %p620_p10 }
  0x65   : > { %630 = shalt.err (!%p627_p5)
}
  0x66   : > { %496 = dma.hbm_to_vmem [thread:$0]  (!%p790_p13), %s887_s4, 128, %s891_s20, %s805_s8, %s707_s30, %s707_s30, %s708_s9  }
  0x67   : > { %p1004_p2 = scmp.ne.s32.totalorder %s1002_s19, 0 }
  0x68   : > { %s921_s0 = sand.u32 (!%p1004_p2), 1, %s693_s13   ;;  %p1005_p1 = scmp.ne.s32.totalorder (!%p1004_p2), %s996_s22, 0 }
  0x69   : > { %209 = sbr.rel (%p1004_p2) target bundleno = 146 (0x92), region = 32  ;;  %s462_s10 = sshll.u32 (!%p1004_p2), %s921_s0, 3 }
  0x6a   : > { %s212_s27 = scalar_lea.sflag (!%p1004_p2), [#allocation3], %s921_s0  ;;  %s215_s7 = scalar_lea.vmem (!%p1004_p2), [#allocation2], %s462_s10 }
  0x70   : > { %676 = dma.done.wait (%p1005_p1), %s212_s27, 128  }
  0x71   : > { %678 = vsyncadd (%p1005_p1), %s212_s27, 4294967168  ;;  %s220_s26 = sand.u32 1, %s754_s16   ;;  %s463_s8 = sshll.u32 %s921_s0, 2 }
  0x72   : > { %s221_s19 = scalar_lea.sflag [#allocation6], %s220_s26  ;;  %s224_s30 = scalar_lea.vmem [#allocation5], %s463_s8 }
  0x73   : > { %680 = dma.done.wait (%p1005_p1), %s221_s19, 192  }
  0x74   : > { %682 = vsyncadd (%p1005_p1), %s221_s19, 4294967104  ;;  %vm314_vm0 = vcmask 254976   ;;  %s265_s9 = scalar_lea.vmem [#allocation8], %s462_s10  ;;  %s478_s20 = sshll.u32 %s754_s16, 7  ;;  %v270_v0 = vld [vmem:[%s215_s7] sm:$0x3] }
  0x75   : > { %s333_s4 = sshll.u32 %s265_s9, 4  ;;  %v466_v1 = vld [vmem:[%s224_s30] ss:$0 sm:$0xff]  ;;  %s233_s29 = scalar_lea.vmem [#allocation7], %s462_s10  ;;  %v271_v4 = vld [vmem:[%s215_s7 + $0x2] sm:$0x3]  ;;  %s937_s4 = int_to_ptr.vmem [resolvable:$true] %s333_s4 }
  0x76   : > { %v306_v2 = vld [vmem:[%s233_s29] sm:$0x3]  ;;  %v302_v3 = vadd.f32 %v466_v1, %v270_v0  ;;  %v467_v5 = vld [vmem:[%s224_s30 + $0x1] ss:$0 sm:$0xff]  ;;  %v307_v6 = vld [vmem:[%s233_s29 + $0x2] sm:$0x3]  ;;  %s942_s17 = scalar_lea.hbm %s992_s3, %s478_s20 }
  0x77   : > { %v303_v7 = vadd.f32 %v467_v5, %v271_v4  ;;  %v272_v8 = vld [vmem:[%s215_s7 + $0x4] sm:$0x3]  ;;  %v468_v9 = vld [vmem:[%s224_s30 + $0x2] ss:$0 sm:$0xff]  ;;  %v308_v10 = vld [vmem:[%s233_s29 + $0x4] sm:$0x3] }
  0x78   : > { %v310_v11 = vmul.f32 %v306_v2, %v302_v3  ;;  %v304_v12 = vadd.f32 %v468_v9, %v272_v8  ;;  %v273_v13 = vld [vmem:[%s215_s7 + $0x6] sm:$0x3]  ;;  %v469_v14 = vld [vmem:[%s224_s30 + $0x3] ss:$0 sm:$0xff]  ;;  %v309_v15 = vld [vmem:[%s233_s29 + $0x6] sm:$0x3] }
  0x79   : > { %v311_v16 = vmul.f32 %v307_v6, %v303_v7  ;;  %v305_v17 = vadd.f32 %v469_v14, %v273_v13  ;;  %s320_s28 = scalar_lea.sflag [#allocation4], %s921_s0  ;;  %s631_s25 = scalar_lea.vmem %s937_s4, 128 }
  0x7a   : > { %315 = vst.msk [vmem:[%s265_s9] sm:$0x3] %vm314_vm0, %v310_v11  ;;  %v312_v18 = vmul.f32 %v308_v10, %v304_v12  ;;  %p632_p13 = scmp.ne.s32.totalorder %s937_s4, %s631_s25  ;;  %p1006_p7 = scmp.ne.s32.totalorder %s997_s23, 0 }
  0x7b   : > { %316 = vst.msk [vmem:[%s265_s9 + $0x2] sm:$0x3] %vm314_vm0, %v311_v16  ;;  %v313_v19 = vmul.f32 %v309_v15, %v305_v17  ;;  %s710_s11 = smov [#allocation8]  }
  0x7c   : > { %317 = vst.msk [vmem:[%s265_s9 + $0x4] sm:$0x3] %vm314_vm0, %v312_v18  ;;  %p633_p9 = pnand %p632_p13, %p1006_p7  ;;  %s635_s5 = sshll.u32 %s710_s11, 4  ;;  %s636_s5 = int_to_ptr.vmem [resolvable:$false] %s635_s5 }
  0x7d   : > { %318 = vst.msk [vmem:[%s265_s9 + $0x6] sm:$0x3] %vm314_vm0, %v313_v19  ;;  %s637_s6 = scalar_lea.vmem %s636_s5, 256  ;;  %p638_p12 = scmp.lt.s32.totalorder %s937_s4, %s636_s5 }
  0x7e   : > { %p634_p6 = pneg %p633_p9  ;;  %p639_p0 = scmp.lt.s32.totalorder %s637_s6, %s631_s25 }
  0x80   : > { %p640_p8 = por %p639_p0, %p638_p12 }
  0x82   : > { %p641_p10 = pnand %p640_p8, %p634_p6 }
  0x84   : > { %644 = shalt.err (!%p641_p10)
}
  0x85   : > { %s645_s10 = scalar_lea.hbm %s942_s17, 128  ;;  %s649_s26 = scalar_lea.hbm %s992_s3, 256 }
  0x86   : > { %p646_p11 = scmp.ne.s32.totalorder %s942_s17, %s645_s10  ;;  %p650_p5 = scmp.lt.u32.totalorder %s942_s17, %s992_s3 }
  0x87   : > { %p651_p2 = scmp.lt.u32.totalorder %s649_s26, %s645_s10  ;;  %p653_p13 = scmp.lt.u32.totalorder %s645_s10, %s942_s17 }
  0x88   : > { %p647_p4 = pnand %p646_p11, %p1006_p7 }
  0x89   : > { %p652_p1 = por %p651_p2, %p650_p5 }
  0x8a   : > { %p648_p3 = pneg %p647_p4 }
  0x8b   : > { %p654_p9 = por %p653_p13, %p652_p1 }
  0x8d   : > { %p655_p6 = pnand %p654_p9, %p648_p3 }
  0x8f   : > { %658 = shalt.err (!%p655_p6)
}
  0x90   : > { %s711_s30 = smov 32   ;;  %s712_s9 = smov 2  }
  0x91   : > { %485 = dma.vmem_to_hbm [thread:$0]  (%p1006_p7), %s937_s4, 128, %s942_s17, %s320_s28, %s711_s30, %s711_s30, %s712_s9  }
  0x92 PF: > { %s348_s20 = sand.u32 1, %s689_s12   ;;  %p1007_p12 = scmp.ne.s32.totalorder %s998_s24, 0 }
  0x93   : > { %p1008_p0 = scmp.ge.s32.totalorder %s701_s15, 2  ;;  %s349_s29 = scalar_lea.sflag [#allocation4], %s348_s20 }
  0x95   : > { %p498_p8 = pnand %p1008_p0, %p1007_p12 }
  0x97   : > { %684 = dma.done.wait (!%p498_p8), %s349_s29, 128  }
  0x98   : > { %686 = vsyncadd (!%p498_p8), %s349_s29, 4294967168  ;;  %p19_p10 = scmp.ge.s32.totalorder %s758_s18, 4   ;;  %s1009_s12 = smov %s693_s13 }
  0x99   : > { %s1010_s13 = smov %s697_s14  ;;  %s1011_s14 = smov %s770_s21 }
  0x9a   : > { %s1012_s15 = smov %s758_s18  ;;  %21 = sbr.rel (!%p19_p10) target bundleno = 9 (0x9), region = 101 }
  0xa1   :  { %354 = vsyncpa [#allocation3], 1 }
  0xa2   :  { %356 = vsyncpa [#allocation3 + $0x1], 1 }
  0xa3   :  { %357 = vsyncpa [#allocation6], 1 }
  0xa4   :  { %359 = vsyncpa [#allocation6 + $0x1], 1 }
  0xa5   :  { %360 = vsyncpa [#allocation4], 1 }
  0xa6   :  { %362 = vsyncpa [#allocation4 + $0x1], 1 }

</bundles_post_ra>
